<compile_context>
chip_gen: v6e
topology: v6e:2x2x1
jax: 0.10.0
libtpu: 0.0.40
codegen_flags: <defaults>
</compile_context>

<pallas_src>
import functools

import jax
import jax.numpy as jnp
from jax import lax
from jax.experimental import pallas as pl
from jax.experimental.pallas import tpu as pltpu

_OUT_BLOCK_ELEMS = 8 * 128  # lane-dense partial-sum output block


def _row_mask(tb: int, batch: int):
    """(TB, 1) bool mask: True for rows inside the true batch."""
    row_ids = pl.program_id(0) * tb + lax.broadcasted_iota(jnp.int32, (tb, 1), 0)
    return row_ids < batch


def _kl_loss_kernel(s_ref, t_ref, o_ref, *, inv_t: float, batch: int, tb: int,
                    needs_mask: bool, fast_log_q: bool):
    """Full-C tile. s_ref/t_ref: (TB, C). o_ref: (1, 8, 128) partial sum."""
    s = s_ref[...].astype(jnp.float32)
    t = t_ref[...].astype(jnp.float32)
    if inv_t != 1.0:  # trace-time branch: skip 2 full-tile multiplies at T == 1
        s = s * jnp.float32(inv_t)
        t = t * jnp.float32(inv_t)

    # log_softmax(student) along the lane axis (numerically stable).
    s = s - jnp.max(s, axis=1, keepdims=True)
    log_p = s - jnp.log(jnp.sum(jnp.exp(s), axis=1, keepdims=True))

    # softmax(teacher) + 1e-7.
    t = t - jnp.max(t, axis=1, keepdims=True)
    t_exp = jnp.exp(t)
    sum_t = jnp.sum(t_exp, axis=1, keepdims=True)
    q = t_exp * pl.reciprocal(sum_t, approx=True) + jnp.float32(1e-7)
    if fast_log_q:
        log_q = t - jnp.log(sum_t)  # teacher log-softmax; eps-tail deviation only
    else:
        log_q = jnp.log(q)          # exact PyTorch parity: log(softmax + 1e-7)

    row_kl = jnp.sum(q * (log_q - log_p), axis=1, keepdims=True)  # (TB, 1)
    if needs_mask:
        # Pad rows past the true batch carry garbage; zero only the per-row
        # result (all reductions above are row-local, so valid rows are safe).
        row_kl = jnp.where(_row_mask(tb, batch), row_kl, 0.0)

    partial = jnp.sum(row_kl)
    # Lane-dense unmasked store; wrapper divides the grand total by 1024.
    o_ref[...] = jnp.full(o_ref.shape, partial, dtype=jnp.float32)


def _kl_loss_kernel_chunked(s_ref, t_ref, o_ref, *, inv_t: float, batch: int,
                            tb: int, needs_mask: bool, fast_log_q: bool,
                            num_chunks: int):
    """C-chunked two-pass variant. s_ref/t_ref: (TB, num_chunks, chunk).

    Only (TB, chunk) f32 temporaries are live at any time, so TB can stay
    large even for vocab-scale C.
    """
    inv_t_f = jnp.float32(inv_t)

    def load(ref, c):
        x = ref[:, c, :].astype(jnp.float32)  # (TB, chunk)
        if inv_t != 1.0:
            x = x * inv_t_f
        return x

    # Pass 1: online row max + sum(exp) for student and teacher.
    def pass1(c, carry):
        m_s, l_s, m_t, l_t = carry
        s = load(s_ref, c)
        t = load(t_ref, c)
        m_s_new = jnp.maximum(m_s, jnp.max(s, axis=1, keepdims=True))
        l_s = l_s * jnp.exp(m_s - m_s_new) + jnp.sum(
            jnp.exp(s - m_s_new), axis=1, keepdims=True)
        m_t_new = jnp.maximum(m_t, jnp.max(t, axis=1, keepdims=True))
        l_t = l_t * jnp.exp(m_t - m_t_new) + jnp.sum(
            jnp.exp(t - m_t_new), axis=1, keepdims=True)
        return m_s_new, l_s, m_t_new, l_t

    neg_inf = jnp.full((tb, 1), -jnp.inf, jnp.float32)
    zeros = jnp.zeros((tb, 1), jnp.float32)
    m_s, l_s, m_t, l_t = lax.fori_loop(0, num_chunks, pass1,
                                       (neg_inf, zeros, neg_inf, zeros))
    log_zs = jnp.log(l_s)
    log_zt = jnp.log(l_t)
    inv_lt = pl.reciprocal(l_t, approx=True)

    # Pass 2: accumulate the row-wise KL terms chunk by chunk.
    def pass2(c, acc):
        s = load(s_ref, c)
        t = load(t_ref, c)
        log_p = (s - m_s) - log_zs
        t_c = t - m_t
        q = jnp.exp(t_c) * inv_lt + jnp.float32(1e-7)
        if fast_log_q:
            log_q = t_c - log_zt
        else:
            log_q = jnp.log(q)
        return acc + jnp.sum(q * (log_q - log_p), axis=1, keepdims=True)

    row_kl = lax.fori_loop(0, num_chunks, pass2, zeros)  # (TB, 1)
    if needs_mask:
        row_kl = jnp.where(_row_mask(tb, batch), row_kl, 0.0)

    partial = jnp.sum(row_kl)
    o_ref[...] = jnp.full(o_ref.shape, partial, dtype=jnp.float32)


def _vmem_caps():
    """(vmem_limit_bytes, block_budget_bytes) derived from the actual part."""
    default_cap = 64 * 1024 * 1024  # v7x per-TC capacity = smallest current part
    try:
        info = pltpu.get_tpu_info()
        cap = int(getattr(info, "vmem_capacity_bytes", default_cap) or default_cap)
    except Exception:  # query unavailable -> stay v7x-safe
        cap = default_cap
    vmem_limit = min((cap * 3) // 4, 100 * 1024 * 1024)  # 96 MiB v5e/v6e, 48 MiB v7x
    block_budget = (vmem_limit * 2) // 3                 # 64 MiB v5e/v6e, 32 MiB v7x
    return int(vmem_limit), int(block_budget)


def _pick_col_chunk(C: int):
    for cand in (2048, 1024, 512, 256, 128):
        if C % cand == 0:
            return cand
    return None


def _choose_block_rows(B: int, C: int, itemsize: int, block_budget: int,
                       chunk) -> int:
    """Largest batch tile (multiple of 8) fitting the generation-aware budget."""
    if chunk is not None:
        # Inputs: 2 arrays x 2 pipeline buffers at native dtype (full C);
        # f32 temporaries (~9 live tiles) only span the current chunk.
        per_row = C * (2 * 2 * itemsize) + chunk * 9 * 4 + 64
    else:
        # ~9 full-C f32 temporaries stay live in the fused full-tile kernel.
        per_row = C * (2 * 2 * itemsize + 9 * 4)
    cap_rows = max(8, block_budget // max(per_row, 1))
    tb = min(B, 2048, cap_rows)
    if B >= 16:
        # Keep >= 2 grid blocks so dual-TensorCore parts (v7x) can shard the
        # "parallel" batch axis; costs one extra ~0.35us grid step elsewhere.
        tb = min(tb, max(8, ((B // 2) // 8) * 8))
    if tb < B:
        tb = max(8, (tb // 8) * 8)  # (8, 128) block-shape constraint
    return tb


def kl_loss(student_logits, teacher_logits, temperature: float = 1.0, *,
            block_rows: int | None = None, col_chunk: int | None = None,
            fast_log_q: bool = False):
    """Pallas TPU implementation of KL_Loss.forward.

    Args:
      student_logits, teacher_logits: (B, C) arrays (any float dtype; DMA'd at
        native dtype, upcast to f32 inside the kernel).
      temperature: distillation temperature T.
      block_rows: optional batch-tile override (testing).
      col_chunk: optional column-chunk override; forces the C-chunked kernel.
      fast_log_q: use teacher log-softmax for log(q) (faster, eps-tail deviation
        from PyTorch). Default False = exact parity.

    Returns:
      scalar float32 loss.
    """
    assert student_logits.shape == teacher_logits.shape
    assert student_logits.ndim == 2, "expected (batch, classes) logits"
    B, C = student_logits.shape
    itemsize = jnp.dtype(student_logits.dtype).itemsize

    vmem_limit, block_budget = _vmem_caps()

    # Decide on C-chunking (large vocab) vs the fused full-tile kernel.
    chunk = None
    if col_chunk is not None:
        assert col_chunk % 128 == 0 and C % col_chunk == 0, \
            "col_chunk must be a multiple of 128 dividing C"
        chunk = int(col_chunk)
    elif C >= 4096:
        chunk = _pick_col_chunk(C)
    if chunk is not None and chunk >= C:
        chunk = None  # a single chunk is just the full-tile kernel

    TB = block_rows if block_rows is not None else _choose_block_rows(
        B, C, itemsize, block_budget, chunk)
    TB = min(TB, B)
    num_blocks = -(-B // TB)
    needs_mask = (B % TB) != 0
    inv_t = 1.0 / float(temperature)

    if chunk is not None:
        num_chunks = C // chunk
        kernel = functools.partial(
            _kl_loss_kernel_chunked, inv_t=inv_t, batch=B, tb=TB,
            needs_mask=needs_mask, fast_log_q=fast_log_q, num_chunks=num_chunks)
        # Minor-dim reshape is a free view; lets the kernel index chunks on a
        # non-lane dimension instead of dynamic lane-dim slicing.
        s_in = student_logits.reshape(B, num_chunks, chunk)
        t_in = teacher_logits.reshape(B, num_chunks, chunk)
        in_specs = [
            pl.BlockSpec((TB, num_chunks, chunk), lambda i: (i, 0, 0)),
            pl.BlockSpec((TB, num_chunks, chunk), lambda i: (i, 0, 0)),
        ]
    else:
        kernel = functools.partial(
            _kl_loss_kernel, inv_t=inv_t, batch=B, tb=TB,
            needs_mask=needs_mask, fast_log_q=fast_log_q)
        s_in, t_in = student_logits, teacher_logits
        in_specs = [
            pl.BlockSpec((TB, C), lambda i: (i, 0)),
            pl.BlockSpec((TB, C), lambda i: (i, 0)),
        ]

    partials = pl.pallas_call(
        kernel,
        out_shape=jax.ShapeDtypeStruct((num_blocks, 8, 128), jnp.float32),
        grid=(num_blocks,),
        in_specs=in_specs,
        out_specs=pl.BlockSpec((1, 8, 128), lambda i: (i, 0, 0)),
        compiler_params=pltpu.CompilerParams(
            dimension_semantics=("parallel",),
            vmem_limit_bytes=vmem_limit,
        ),
    )(s_in, t_in)

    T = jnp.float32(temperature)
    # Every lane of each (1, 8, 128) output block holds the same partial value,
    # so an unstrided full sum divided by 1024 replaces the strided gather.
    total = jnp.sum(partials) * jnp.float32(1.0 / _OUT_BLOCK_ELEMS)
    return (T * T) * total / jnp.float32(B)


def _kl_loss_ref(student_logits, teacher_logits, temperature: float = 1.0):
    """Pure-JAX reference (mirrors the PyTorch module)."""
    T = temperature
    log_p = jax.nn.log_softmax(student_logits.astype(jnp.float32) / T, axis=1)
    q = jax.nn.softmax(teacher_logits.astype(jnp.float32) / T, axis=1) + 1e-7
    return T * T * jnp.sum(q * (jnp.log(q) - log_p)) / student_logits.shape[0]


if __name__ == "__main__":
    key = jax.random.PRNGKey(0)
    k1, k2, k3, k4, k5, k6 = jax.random.split(key, 6)

    # Case 1: small f32, T=2, single block, fused full-tile kernel.
    B, C = 8, 32
    s1 = jax.random.normal(k1, (B, C), dtype=jnp.float32)
    t1 = jax.random.normal(k2, (B, C), dtype=jnp.float32)
    loss1 = kl_loss(s1, t1, temperature=2.0)
    jax.block_until_ready(loss1)
    ref1 = _kl_loss_ref(s1, t1, temperature=2.0)
    assert jnp.allclose(loss1, ref1, rtol=1e-3, atol=1e-5), (loss1, ref1)

    # Case 2: bf16, B=20 with block_rows=8 -> 3 blocks, masked partial last tile.
    B2, C2 = 20, 32
    s2 = jax.random.normal(k3, (B2, C2), dtype=jnp.bfloat16)
    t2 = jax.random.normal(k4, (B2, C2), dtype=jnp.bfloat16)
    loss2 = kl_loss(s2, t2, temperature=2.0, block_rows=8)
    jax.block_until_ready(loss2)
    ref2 = _kl_loss_ref(s2, t2, temperature=2.0)
    assert jnp.allclose(loss2, ref2, rtol=2e-2, atol=1e-3), (loss2, ref2)

    # Case 3: C-chunked two-pass kernel (forced), T=1 fast path, 2 batch blocks.
    B3, C3 = 16, 512
    s3 = jax.random.normal(k5, (B3, C3), dtype=jnp.float32)
    t3 = jax.random.normal(k6, (B3, C3), dtype=jnp.float32)
    loss3 = kl_loss(s3, t3, temperature=1.0, col_chunk=128)
    jax.block_until_ready(loss3)
    ref3 = _kl_loss_ref(s3, t3, temperature=1.0)
    assert jnp.allclose(loss3, ref3, rtol=1e-3, atol=1e-5), (loss3, ref3)

    # Case 4: fast_log_q variant (eps-tail deviation only) on the full-tile path.
    loss4 = kl_loss(s3, t3, temperature=1.0, fast_log_q=True)
    jax.block_until_ready(loss4)
    assert jnp.allclose(loss4, ref3, rtol=1e-3, atol=1e-4), (loss4, ref3)

    print("KERNEL_OK")
</pallas_src>

<mosaic_0001>
module attributes {stable_mosaic.version = 11 : i64} {
  func.func @_kl_loss_kernel(%arg0: i32, %arg1: memref<8x32xf32, #tpu.memory_space<vmem>>, %arg2: memref<8x32xf32, #tpu.memory_space<vmem>>, %arg3: memref<1x8x128xf32, #tpu.memory_space<vmem>>) attributes {dimension_semantics = [#tpu.dimension_semantics<parallel>], iteration_bounds = array<i64: 1>, scalar_prefetch = 0 : i64, scratch_operands = 0 : i64, tpu.core_type = #tpu.core_type<tc>, window_params = [{transform_indices = @transform_0, window_bounds = array<i64: 8, 32>}, {transform_indices = @transform_1, window_bounds = array<i64: 8, 32>}, {transform_indices = @transform_2, window_bounds = array<i64: 1, 8, 128>}]} {
    %c0 = arith.constant 0 : index
    %c0_0 = arith.constant 0 : index
    %0 = vector.load %arg1[%c0, %c0_0] : memref<8x32xf32, #tpu.memory_space<vmem>>, vector<8x32xf32>
    %c0_1 = arith.constant 0 : index
    %c0_2 = arith.constant 0 : index
    %1 = vector.load %arg2[%c0_1, %c0_2] : memref<8x32xf32, #tpu.memory_space<vmem>>, vector<8x32xf32>
    %cst = arith.constant 5.000000e-01 : f32
    %2 = vector.broadcast %cst : f32 to vector<8x32xf32>
    %3 = arith.mulf %0, %2 : vector<8x32xf32>
    %cst_3 = arith.constant 5.000000e-01 : f32
    %4 = vector.broadcast %cst_3 : f32 to vector<8x32xf32>
    %5 = arith.mulf %1, %4 : vector<8x32xf32>
    %cst_4 = arith.constant dense<0xFF800000> : vector<8xf32>
    %6 = vector.multi_reduction <maximumf>, %3, %cst_4 [1] : vector<8x32xf32> to vector<8xf32>
    %7 = vector.shape_cast %6 : vector<8xf32> to vector<8x1xf32>
    %8 = vector.broadcast %7 : vector<8x1xf32> to vector<8x32xf32>
    %9 = arith.subf %3, %8 : vector<8x32xf32>
    %10 = math.exp %9 : vector<8x32xf32>
    %cst_5 = arith.constant dense<0.000000e+00> : vector<8xf32>
    %11 = vector.multi_reduction <add>, %10, %cst_5 [1] : vector<8x32xf32> to vector<8xf32>
    %12 = vector.shape_cast %11 : vector<8xf32> to vector<8x1xf32>
    %13 = math.log %12 : vector<8x1xf32>
    %14 = vector.broadcast %13 : vector<8x1xf32> to vector<8x32xf32>
    %15 = arith.subf %9, %14 : vector<8x32xf32>
    %cst_6 = arith.constant dense<0xFF800000> : vector<8xf32>
    %16 = vector.multi_reduction <maximumf>, %5, %cst_6 [1] : vector<8x32xf32> to vector<8xf32>
    %17 = vector.shape_cast %16 : vector<8xf32> to vector<8x1xf32>
    %18 = vector.broadcast %17 : vector<8x1xf32> to vector<8x32xf32>
    %19 = arith.subf %5, %18 : vector<8x32xf32>
    %20 = math.exp %19 : vector<8x32xf32>
    %cst_7 = arith.constant dense<0.000000e+00> : vector<8xf32>
    %21 = vector.multi_reduction <add>, %20, %cst_7 [1] : vector<8x32xf32> to vector<8xf32>
    %22 = vector.shape_cast %21 : vector<8xf32> to vector<8x1xf32>
    %23 = tpu.reciprocal %22 {approx = true} : vector<8x1xf32> -> vector<8x1xf32>
    %24 = vector.broadcast %23 : vector<8x1xf32> to vector<8x32xf32>
    %25 = arith.mulf %20, %24 : vector<8x32xf32>
    %cst_8 = arith.constant 1.000000e-07 : f32
    %26 = vector.broadcast %cst_8 : f32 to vector<8x32xf32>
    %27 = arith.addf %25, %26 : vector<8x32xf32>
    %28 = math.log %27 : vector<8x32xf32>
    %29 = arith.subf %28, %15 : vector<8x32xf32>
    %30 = arith.mulf %27, %29 : vector<8x32xf32>
    %cst_9 = arith.constant dense<0.000000e+00> : vector<8xf32>
    %31 = vector.multi_reduction <add>, %30, %cst_9 [1] : vector<8x32xf32> to vector<8xf32>
    %32 = vector.shape_cast %31 : vector<8xf32> to vector<8x1xf32>
    %33 = vector.shape_cast %32 : vector<8x1xf32> to vector<1x8x1xf32>
    %cst_10 = arith.constant dense<0.000000e+00> : vector<1xf32>
    %34 = vector.multi_reduction <add>, %33, %cst_10 [1, 2] : vector<1x8x1xf32> to vector<1xf32>
    %35 = vector.shape_cast %34 : vector<1xf32> to vector<1x1x1xf32>
    %36 = vector.extract %35[0, 0, 0] : f32 from vector<1x1x1xf32>
    %37 = vector.broadcast %36 : f32 to vector<1x8x128xf32>
    %c0_11 = arith.constant 0 : index
    %c0_12 = arith.constant 0 : index
    %c0_13 = arith.constant 0 : index
    %38 = vector.load %arg3[%c0_11, %c0_12, %c0_13] : memref<1x8x128xf32, #tpu.memory_space<vmem>>, vector<1x8x128xf32>
    tpu.vector_store %arg3[%c0_11, %c0_12, %c0_13], %37 {strides = array<i32>} : memref<1x8x128xf32, #tpu.memory_space<vmem>>, vector<1x8x128xf32>,
    return
  }
  func.func @transform_0(%arg0: i32) -> (i32, i32) {
    %c0_i32 = arith.constant 0 : i32
    %c0_i32_0 = arith.constant 0 : i32
    return %arg0, %c0_i32 : i32, i32
  }
  func.func @transform_1(%arg0: i32) -> (i32, i32) {
    %c0_i32 = arith.constant 0 : i32
    %c0_i32_0 = arith.constant 0 : i32
    return %arg0, %c0_i32 : i32, i32
  }
  func.func @transform_2(%arg0: i32) -> (i32, i32, i32) {
    %c0_i32 = arith.constant 0 : i32
    %c0_i32_0 = arith.constant 0 : i32
    %c0_i32_1 = arith.constant 0 : i32
    return %arg0, %c0_i32, %c0_i32_0 : i32, i32, i32
  }
}

</mosaic_0001>

<bundles_post_ra>
// kernel: tpu_custom_call.1
= control target key start
LH: loop header
LB: loop body
LE: loop exit
PB: predicated region body
PF: predicated region fallthrough
CT: control target
= control target key end

     0   :  { %7 = vsyncpa [#allocation3], 0  ;;  %s214_s0 = inlined_call_operand.hbm [shape: f32[8,32], index: 0, kind: input, shape index: {}]   ;;  %s215_s1 = inlined_call_operand.hbm [shape: f32[8,32], index: 1, kind: input, shape index: {}]   ;;  %s216_s2 = inlined_call_operand.hbm [shape: f32[1,8,128], index: 2, kind: output, shape index: {}]  }
   0x1   :  { %8 = vsyncpa [#allocation6], 0 }
   0x2   :  { %9 = vsyncpa [#allocation4], 0  ;;  %s182_s9 = smov [#allocation2]   ;;  %s183_s11 = smov [#allocation5]  }
   0x3   :  { %s16_s10 = sshll.u32 %s182_s9, 4  ;;  %s26_s12 = sshll.u32 %s183_s11, 4  ;;  %s17_s10 = int_to_ptr.vmem [resolvable:$true] %s16_s10  ;;  %s27_s12 = int_to_ptr.vmem [resolvable:$true] %s26_s12 }
   0x4   :  { %s124_s13 = scalar_lea.vmem %s17_s10, 128  ;;  %p129_p1 = scmp.lt.s32.totalorder %s17_s10, %s17_s10 }
   0x5   :  { %p125_p0 = scmp.ne.s32.totalorder %s17_s10, %s124_s13  ;;  %p130_p2 = scmp.lt.s32.totalorder %s124_s13, %s124_s13 }
   0x7   :  { %p131_p3 = por %p130_p2, %p129_p1 }
   0x9   :  { %p132_p4 = pnand %p131_p3, %p125_p0 }
   0xb   :  { %135 = shalt.err (!%p132_p4)
}
   0xc   :  { %19 = dma.hbm_to_vmem [thread:$0]  %s214_s0, 128, %s17_s10, [#allocation3]  }
   0xd   :  { %s144_s16 = scalar_lea.vmem %s27_s12, 128  ;;  %p149_p6 = scmp.lt.s32.totalorder %s27_s12, %s27_s12 }
   0xe   :  { %p145_p5 = scmp.ne.s32.totalorder %s27_s12, %s144_s16  ;;  %p150_p7 = scmp.lt.s32.totalorder %s144_s16, %s144_s16 }
  0x10   :  { %p151_p8 = por %p150_p7, %p149_p6 }
  0x12   :  { %p152_p9 = pnand %p151_p8, %p145_p5 }
  0x14   :  { %155 = shalt.err (!%p152_p9)
}
  0x15   :  { %29 = dma.hbm_to_vmem [thread:$0]  %s215_s1, 128, %s27_s12, [#allocation6]  }
  0x16   :  { %176 = dma.done.wait [#allocation3], 128  }
  0x17   :  { %177 = vsyncadd [#allocation3], 4294967168 }
  0x18   :  { %178 = dma.done.wait [#allocation6], 128  }
  0x19   :  { %179 = vsyncadd [#allocation6], 4294967168  ;;  %v37_v0 = vld [vmem:[#allocation5] sm:$0xff]  ;;  %vm40_vm0 = vcmask 261120   ;;  %v36_v1 = vld [vmem:[#allocation2] sm:$0xff]  ;;  %vm72_vm1 = vcmask 7168  }
  0x1a   :  { %v39_v2 = vmul.f32 0.5, %v37_v0  ;;  %v38_v3 = vmul.f32 0.5, %v36_v1  ;;  %s184_s0 = smov [#allocation7]  }
  0x1b   :  { %s91_s1 = sshll.u32 %s184_s0, 4  ;;  %s92_s1 = int_to_ptr.vmem [resolvable:$true] %s91_s1 }
  0x1c   :  { %v53_v4 = vsel %vm40_vm0, %v39_v2, -inf  ;;  %v41_v5 = vsel %vm40_vm0, %v38_v3, -inf  ;;  %s156_s20 = scalar_lea.vmem %s92_s1, 128  ;;  %p161_p11 = scmp.lt.s32.totalorder %s92_s1, %s92_s1 }
  0x1d   :  { %54 = vmax.xlane.f32.xlu0 %v53_v4  ;;  %p157_p10 = scmp.ne.s32.totalorder %s92_s1, %s156_s20  ;;  %p162_p12 = scmp.lt.s32.totalorder %s156_s20, %s156_s20 }
  0x1f   :  { %p163_p13 = por %p162_p12, %p161_p11 }
  0x21   :  { %42 = vmax.xlane.f32.xlu0 %v41_v5  ;;  %p164_p0 = pnand %p163_p13, %p157_p10 }
  0xa6   :  { %v55_v6 = vpop.xlane.xlu0 %54 }
  0xa7   :  { %v56_v7 = vsub.f32 %v39_v2, %v55_v6 }
  0xa9   :  { %v57_v8 = vmul.f32 1.442695, %v56_v7 }
  0xaa   :  { %v43_v9 = vpop.xlane.xlu0 %42 }
  0xab   :  { %106 = vpow2.f32 %v57_v8  ;;  %v44_v10 = vsub.f32 %v38_v3, %v43_v9 }
  0xad   :  { %v45_v11 = vmul.f32 1.442695, %v44_v10 }
  0xaf   :  { %108 = vpow2.f32 %v45_v11 }
  0xb8   :  { %v107_v12 = vpop.eup %106 }
  0xb9   :  { %v59_v13 = vsel %vm40_vm0, %v107_v12, 0.0 }
  0xba   :  { %60 = vadd.xlane.f32.xlu1 %v59_v13 }
  0xbc   :  { %v109_v14 = vpop.eup %108 }
  0xbd   :  { %v47_v15 = vsel %vm40_vm0, %v109_v14, 0.0 }
  0xbe   :  { %48 = vadd.xlane.f32.xlu1 %v47_v15 }
 0x143   :  { %v61_v16 = vpop.xlane.xlu1 %60 }
 0x144   :  { %110 = vrcp.f32 %v61_v16 }
 0x147   :  { %v49_v17 = vpop.xlane.xlu1 %48 }
 0x148   :  { %112 = vlog2.f32 %v49_v17 }
 0x151   :  { %v111_v18 = vpop.eup %110 }
 0x152   :  { %v63_v19 = vmul.f32 %v111_v18, %v107_v12 }
 0x154   :  { %v64_v20 = vadd.f32 1e-07, %v63_v19 }
 0x155   :  { %v113_v21 = vpop.eup %112 }
 0x156   :  { %114 = vlog2.f32 %v64_v20  ;;  %v51_v22 = vmul.f32 0.6931472, %v113_v21 }
 0x158   :  { %v52_v24 = vsub.f32 %v44_v10, %v51_v22 }
 0x163   :  { %v115_v23 = vpop.eup %114 }
 0x164   :  { %v66_v25 = vmul.f32 0.6931472, %v115_v23 }
 0x166   :  { %v67_v26 = vsub.f32 %v66_v25, %v52_v24 }
 0x168   :  { %v68_v27 = vmul.f32 %v67_v26, %v64_v20 }
 0x16a   :  { %v69_v28 = vsel %vm40_vm0, %v68_v27, 0.0 }
 0x16b   :  { %70 = vadd.xlane.f32.xlu0 %v69_v28 }
 0x1f4   :  { %v71_v29 = vpop.xlane.xlu0 %70 }
 0x1f5   :  { %v73_v30 = vsel %vm72_vm1, %v71_v29, 0.0 }
 0x1f6   :  { %74 = vadd.xlane.f32.xlu1 %v73_v30 }
 0x27f   :  { %v75_v31 = vpop.xlane.xlu1 %74 }
 0x280   :  { %v76_v32 = vrot.slane %v75_v31, 4 }
 0x282   :  { %v77_v33 = vadd.f32 %v76_v32, %v75_v31 }
 0x284   :  { %v78_v34 = vrot.slane %v77_v33, 2 }
 0x286   :  { %v79_v35 = vadd.f32 %v78_v34, %v77_v33 }
 0x288   :  { %v80_v36 = vrot.slane %v79_v35, 1 }
 0x28a   :  { %v81_v37 = vadd.f32 %v80_v36, %v79_v35 }
 0x28c   :  { %101 = vpush %v81_v37 }
 0x2bd   :  { %s102_s19 = spop %101 }
 0x2be   :  { %v83_v38 = vstv %s102_s19 }
 0x2bf   :  { %84 = vst [vmem:[#allocation7] sm:$0xff] %v83_v38 }
 0x2c0   :  { %167 = shalt.err (!%p164_p0)
}
 0x2c1   :  { %94 = dma.vmem_to_hbm [thread:$0]  %s92_s1, 128, %s216_s2, [#allocation4]  }
 0x2c2   :  { %180 = dma.done.wait [#allocation4], 128  }
 0x2c3   :  { %181 = vsyncadd [#allocation4], 4294967168 }
 0x2c4   :  { %98 = vsyncpa [#allocation3], 1 }
 0x2c5   :  { %99 = vsyncpa [#allocation6], 1 }
 0x2c6   :  { %100 = vsyncpa [#allocation4], 1 }

</bundles_post_ra>
